<compile_context>
chip_gen: v6e
topology: v6e:2x2x1
jax: 0.10.0
libtpu: 0.0.40
codegen_flags: <defaults>
</compile_context>

<pallas_src>
import functools

import jax
import jax.numpy as jnp
from jax.experimental import pallas as pl
from jax.experimental.pallas import tpu as pltpu


# ------------------------------ fused Pallas kernel -------------------------

def _stgcn_kernel(x_ref, a_ref, we_ref, bias_ref, wc_ref,
                  w1_ref, b1_ref, w2_ref, b2_ref, o_ref, h_ref):
    """One grid step == one ST layer.  Activations persist in h_ref (VMEM).

    x_ref   : [N, T*Din]  f32     raw node features (resident)
    a_ref   : [N, N]      f32     normalized GCN adjacency (resident)
    we_ref  : [T*Din, HT] bf16    embedding weight (layout fold included)
    bias_ref: [L+1, 1, HT] f32    row 0 = embedding bias, rows 1..L = b_comb[l]
    wc_ref  : [1, HT, HT] bf16    this layer's combined (GCN∘Conv1d∘BN) weight
    w1/b1, w2/b2                  output head (resident)
    h_ref   : [N, HT]     f32     activation carry (scratch)
    """
    f32, bf16 = jnp.float32, jnp.bfloat16
    l = pl.program_id(0)

    # ---- first grid step only: per-timestep embedding + ReLU -------------
    @pl.when(l == 0)
    def _embed():
        e = jnp.dot(x_ref[...].astype(bf16), we_ref[...],
                    preferred_element_type=f32) + bias_ref[0]
        h_ref[...] = jnp.maximum(e, 0.0)

    # ---- ST layer l: spatial agg + combined (GCN lin ∘ temporal conv ∘ BN)
    #      + residual (Identity) + ReLU ------------------------------------
    h = h_ref[...]
    ax = jnp.dot(a_ref[...], h, preferred_element_type=f32)        # [N,N]x[N,HT]
    z = jnp.dot(ax.astype(bf16), wc_ref[0],
                preferred_element_type=f32) + bias_ref[l + 1]       # [N,HT]x[HT,HT]
    h_ref[...] = jnp.maximum(z + h, 0.0)
    # TODO(synk): inter-layer F.dropout(p=0.2) is identity in eval mode.

    # ---- last grid step only: Linear -> ReLU -> (Dropout=id) -> Linear ----
    @pl.when(l == pl.num_programs(0) - 1)
    def _head():
        hid = jnp.dot(h_ref[...].astype(bf16), w1_ref[...],
                      preferred_element_type=f32) + b1_ref[...]
        hid = jnp.maximum(hid, 0.0)
        o_ref[...] = jnp.dot(hid, w2_ref[...],
                             preferred_element_type=f32) + b2_ref[...]


# ------------------------------ hot path ------------------------------------

def stgcn_apply(x, a_hat, we_emb, bias_pack, w_comb, w1, b1, w2, b2):
    """Jit-able hot path: single pallas_call with a layer grid."""
    n = x.shape[0]
    num_layers, ht, _ = w_comb.shape
    out_dim = w2.shape[1]

    def resident(a):  # whole array, constant index_map -> stays in VMEM
        nd = a.ndim
        return pl.BlockSpec(a.shape, lambda l, _nd=nd: (0,) * _nd)

    grid_spec = pltpu.PrefetchScalarGridSpec(
        num_scalar_prefetch=0,
        grid=(num_layers,),
        in_specs=[
            resident(x),
            resident(a_hat),
            resident(we_emb),
            resident(bias_pack),
            pl.BlockSpec((1, ht, ht), lambda l: (l, 0, 0)),   # per-layer weight,
            resident(w1),                                     # double-buffered
            resident(b1),
            resident(w2),
            resident(b2),
        ],
        out_specs=pl.BlockSpec((n, out_dim), lambda l: (0, 0)),
        scratch_shapes=[pltpu.VMEM((n, ht), jnp.float32)],
    )
    return pl.pallas_call(
        _stgcn_kernel,
        out_shape=jax.ShapeDtypeStruct((n, out_dim), jnp.float32),
        grid_spec=grid_spec,
        compiler_params=pltpu.CompilerParams(
            dimension_semantics=("arbitrary",)),
    )(x, a_hat, we_emb, bias_pack, w_comb, w1, b1, w2, b2)


# ------------------------------ host-side prep (run once) -------------------

def build_gcn_adj(edge_index, n):
    """Dense normalized GCN adjacency: D^-1/2 (A + I) D^-1/2 (PyG gcn_norm,
    degree = in-degree + self-loop).  Also applies STGCNModel.filter_edge_index
    (drop edges touching node >= n).  Duplicate edges are summed."""
    src, dst = edge_index[0], edge_index[1]
    valid = ((src < n) & (dst < n)).astype(jnp.float32)
    src_c = jnp.clip(src, 0, n - 1)
    dst_c = jnp.clip(dst, 0, n - 1)
    deg = jnp.zeros((n,), jnp.float32).at[dst_c].add(valid) + 1.0  # + self-loop
    dinv = jax.lax.rsqrt(deg)
    w = valid * dinv[src_c] * dinv[dst_c]
    a = jnp.zeros((n, n), jnp.float32).at[dst_c, src_c].add(w)
    a = a + jnp.diag(dinv * dinv)  # self loops
    return a


def fold_params(params, seq_len):
    """Exactly refactor canonical (PyTorch-layout) params into the fused-kernel
    layout: Kronecker placement / tiling / permutation of the original weights,
    then combine (Wsp_big @ Wtm_big) * bn_scale into ONE matrix per layer
    (HIGHEST-precision host matmul), and cast matmul weights to bf16.

    Canonical flat index used by the ST layers / head:  j = c*T + t
    Kernel-internal (lane-dense) flat index:             q = t*C + c
    """
    T = seq_len
    hi = jax.lax.Precision.HIGHEST
    f32, bf16 = jnp.float32, jnp.bfloat16

    we = params["we"].astype(f32)                 # [Din, H]
    h = we.shape[1]
    ht = h * T
    q = jnp.arange(ht)
    perm = (q % h) * T + (q // h)                 # q -> j
    eye_t = jnp.eye(T, dtype=f32)

    # embedding: block-diagonal over timesteps, columns permuted so the output
    # lands directly in the kernel's flat layout (folds the PyTorch
    # cat/reshape/view buffer reinterpretation into the weight exactly).
    we_emb = jnp.kron(eye_t, we)[:, perm]                          # [T*Din, HT]
    be_emb = jnp.tile(params["be"].reshape(-1), T)[perm][None, :]  # [1, HT]

    w_comb, b_comb = [], []
    for lp in params["st_layers"]:
        # per-timestep GCN linear -> block-diagonal [HT, HT]
        wsp = jnp.kron(eye_t, lp["ws"].astype(f32))
        bsp = jnp.tile(lp["bs"].reshape(-1), T)[None, :]
        # Conv1d (kernel=3, padding=1): tap k reads timestep t+k-1 -> banded
        taps = lp["wt"].astype(f32)                                # [3, H, H]
        wtm = jnp.zeros((ht, ht), f32)
        for kk in range(3):
            wtm = wtm + jnp.kron(jnp.eye(T, k=1 - kk, dtype=f32), taps[kk])
        btm = jnp.tile(lp["bt"].reshape(-1), T)[None, :]
        scale = jnp.tile(lp["bn_scale"].reshape(-1), T)[None, :]
        shift = jnp.tile(lp["bn_shift"].reshape(-1), T)[None, :]
        # combined per-layer weight/bias (exact algebra, column scale):
        #   relu(((ax@Wsp+bsp)@Wtm+btm)*scale+shift + h)
        # = relu(ax@W_comb + b_comb + h)
        w_comb.append(jnp.dot(wsp, wtm, precision=hi) * scale)
        b_comb.append((jnp.dot(bsp, wtm, precision=hi) + btm) * scale + shift)

    # pack all per-layer vectors: row 0 = embedding bias, rows 1..L = b_comb[l]
    bias_pack = jnp.concatenate([be_emb[None], jnp.stack(b_comb)], axis=0)

    return (we_emb.astype(bf16),
            bias_pack.astype(f32),
            jnp.stack(w_comb).astype(bf16),
            params["w1"][perm, :].astype(bf16),    # row-permute head into kernel layout
            params["b1"].astype(f32),
            params["w2"].astype(f32),
            params["b2"].astype(f32))


@functools.partial(jax.jit, static_argnames=("num_nodes", "seq_len"))
def prepare_stgcn(params, edge_index, *, num_nodes, seq_len):
    """One-time prep (off the inference hot path): adjacency + weight fold."""
    a_hat = build_gcn_adj(edge_index, num_nodes)
    return (a_hat,) + fold_params(params, seq_len)


# ---------------------------- deterministic params --------------------------

def init_params(key, din, h, T, out_dim, num_layers=3):
    ks = jax.random.split(key, 4 + num_layers)

    def nrm(k, shape, s=0.1):
        return jax.random.normal(k, shape, jnp.float32) * s

    eps = 1e-5
    p = {"we": nrm(ks[0], (din, h)), "be": nrm(ks[1], (1, h)), "st_layers": []}
    for i in range(num_layers):
        lk = jax.random.split(ks[4 + i], 8)
        ws = nrm(lk[0], (h, h))                      # GCN lin weight (in->out)
        bs = nrm(lk[1], (1, h))
        wt_conv = nrm(lk[2], (h, h, 3))              # torch Conv1d weight [out, in, k]
        wt = jnp.stack([wt_conv[:, :, k].T for k in range(3)], axis=0)  # [3, in, out]
        bt = nrm(lk[3], (1, h))
        gamma = 1.0 + nrm(lk[4], (h,))
        beta = nrm(lk[5], (h,))
        rmean = nrm(lk[6], (h,))
        rvar = 0.5 + jax.random.uniform(lk[7], (h,), jnp.float32)
        scale = gamma / jnp.sqrt(rvar + eps)
        shift = beta - rmean * scale
        p["st_layers"].append(dict(ws=ws, bs=bs, wt=wt, bt=bt,
                                   bn_scale=scale.reshape(1, h),
                                   bn_shift=shift.reshape(1, h)))
    p["w1"] = nrm(ks[2], (h * T, h))
    p["b1"] = nrm(jax.random.fold_in(ks[2], 1), (1, h))
    p["w2"] = nrm(ks[3], (h, out_dim))
    p["b2"] = nrm(jax.random.fold_in(ks[3], 1), (1, out_dim))
    return p


# ----------------------------- pure-JAX reference ---------------------------

def reference_forward(x, edge_index, params, T):
    hi = jax.lax.Precision.HIGHEST
    n = x.shape[0]
    a_hat = build_gcn_adj(edge_index, n)
    din = x.shape[1] // T
    xr = x.reshape(n, T, din)
    emb = jax.nn.relu(
        jnp.einsum("ntd,dh->nth", xr, params["we"], precision=hi) + params["be"][0])
    h_dim = emb.shape[-1]
    h = emb.reshape(n, T * h_dim)
    for lp in params["st_layers"]:
        xc = h.reshape(n, h_dim, T)                                   # [N, C, T]
        spat = jnp.einsum("nm,mct,cd->ndt", a_hat, xc, lp["ws"], precision=hi) \
            + lp["bs"][0][None, :, None]
        spat_pad = jnp.pad(spat, ((0, 0), (0, 0), (1, 1)))
        tconv = jnp.zeros((n, h_dim, T), jnp.float32)
        for k in range(3):
            tconv = tconv + jnp.einsum("nit,io->not",
                                       spat_pad[:, :, k:k + T], lp["wt"][k],
                                       precision=hi)
        tconv = tconv + lp["bt"][0][None, :, None]
        norm = tconv * lp["bn_scale"][0][None, :, None] + lp["bn_shift"][0][None, :, None]
        h = jax.nn.relu(norm + xc).reshape(n, h_dim * T)
    hid = jax.nn.relu(jnp.dot(h, params["w1"], precision=hi) + params["b1"][0])
    return jnp.dot(hid, params["w2"], precision=hi) + params["b2"][0]


# ----------------------------------- main ------------------------------------

if __name__ == "__main__":
    N, T, DIN, H, OUT = 16, 8, 4, 32, 1   # num_nodes, seq_len, per-step dim, hidden, output
    key = jax.random.PRNGKey(0)
    kx, kp = jax.random.split(key)
    x = jax.random.normal(kx, (N, T * DIN), jnp.float32)

    # symmetric ring graph
    idx = jnp.arange(N, dtype=jnp.int32)
    src = jnp.concatenate([idx, (idx + 1) % N])
    dst = jnp.concatenate([(idx + 1) % N, idx])
    edge_index = jnp.stack([src, dst], axis=0)

    params = init_params(kp, DIN, H, T, OUT, num_layers=3)

    # One-time, off the hot path: adjacency + weight fold/combine + bf16 cast.
    folded = prepare_stgcn(params, edge_index, num_nodes=N, seq_len=T)
    folded = jax.block_until_ready(folded)

    # Hot path: jitted, only re-DMAs device-resident folded arrays.
    fwd = jax.jit(stgcn_apply)
    out = jax.block_until_ready(fwd(x, *folded))

    ref = reference_forward(x, edge_index, params, T)
    assert out.shape == (N, OUT)
    # 1e-2 gate: the in-kernel bf16-operand / f32-accumulate matmuls match the
    # accuracy of the TPU's default f32 matmul precision that already passed
    # this gate; the host-side weight combination uses HIGHEST precision.
    assert bool(jnp.allclose(out, ref, rtol=1e-2, atol=1e-2)), "mismatch vs reference"
    print("KERNEL_OK")
</pallas_src>

<mosaic_0001>
module attributes {stable_mosaic.version = 11 : i64} {
  func.func private @main(%arg0: i32) attributes {dimension_semantics = [#tpu.dimension_semantics<core_parallel>], iteration_bounds = array<i64: 2>, tpu.core_type = #tpu.core_type<sc_scalar_subcore>, window_params = []} {
    return
  }
}

module attributes {stable_mosaic.version = 11 : i64} {
  func.func private @main(%arg0: i32) attributes {dimension_semantics = [#tpu.dimension_semantics<core_parallel>], iteration_bounds = array<i64: 2>, tpu.core_type = #tpu.core_type<sc_scalar_subcore>, window_params = []} {
    return
  }
}

</mosaic_0001>

<bundles_post_ra>
// kernel: tile.82
= control target key start
LH: loop header
LB: loop body
LE: loop exit
PB: predicated region body
PF: predicated region fallthrough
CT: control target
= control target key end

     0   :  { %2 = vsyncpa [#allocation1], 0  ;;  %s42_s6 = smov [#allocation0]   ;;  %s59_s0 = inlined_call_operand.hbm [shape: f32[32], index: 0, kind: input, shape index: {}]   ;;  %s60_s1 = inlined_call_operand.vmem [shape: f32[8,32], index: 1, kind: output, shape index: {}]  }
   0x1   :  { %s9_s7 = sshll.u32 %s42_s6, 4  ;;  %s10_s7 = int_to_ptr.vmem [resolvable:$true] %s9_s7 }
   0x2   :  { %s28_s8 = scalar_lea.vmem %s10_s7, 16  ;;  %s32_s9 = scalar_lea.vmem %s10_s7, 32 }
   0x3   :  { %p29_p0 = scmp.ne.s32.totalorder %s10_s7, %s28_s8  ;;  %p33_p1 = scmp.lt.s32.totalorder %s10_s7, %s10_s7 }
   0x4   :  { %p34_p2 = scmp.lt.s32.totalorder %s32_s9, %s28_s8 }
   0x6   :  { %p35_p3 = por %p34_p2, %p33_p1 }
   0x8   :  { %p36_p4 = pnand %p35_p3, %p29_p0 }
   0xa   :  { %39 = shalt.err (!%p36_p4)
}
   0xb   :  { %12 = dma.hbm_to_vmem [thread:$0]  %s59_s0, 16, %s10_s7, [#allocation1]  }
   0xc   :  { %40 = dma.done.wait [#allocation1], 16  }
   0xd   :  { %41 = vsyncadd [#allocation1], 4294967280  ;;  %v16_v0 = vld [vmem:[#allocation0] ss:$0 sm:$0xff] }
   0xe   :  { %17 = vst [vmem:[%s60_s1] sm:$0xff] %v16_v0 }
   0xf   :  { %18 = vsyncpa [#allocation1], 1 }

// kernel: tile.66
= control target key start
LH: loop header
LB: loop body
LE: loop exit
PB: predicated region body
PF: predicated region fallthrough
CT: control target
= control target key end

     0   :  { %s22_s0 = inlined_call_operand.vmem [shape: f32[32], index: 0, kind: input, shape index: {}]   ;;  %s23_s1 = inlined_call_operand.vmem [shape: f32[8,32], index: 1, kind: output, shape index: {}]  }
   0x1   :  { %v4_v0 = vld [vmem:[%s22_s0] ss:$0 sm:$0xff] }
   0x2   :  { %5 = vst [vmem:[%s23_s1] sm:$0xff] %v4_v0 }

</bundles_post_ra>
